<compile_context>
chip_gen: v5e
topology: v5e:2x2
jax: 0.10.0
libtpu: 0.0.40
codegen_flags: <defaults>
</compile_context>

<pallas_src>
import functools

import jax
import jax.numpy as jnp
from jax.experimental import pallas as pl
from jax.experimental.pallas import tpu as pltpu

LANES = 128
MAX_TILE_ROWS = 1024   # 1024x128 f32 block = 512 KiB; 2 inputs x 2 buffers = 2 MiB VMEM
NUM_SHARDS = 2         # split reduction across TensorCores (v7x); harmless on 1-TC chips


def _row_pack(dtype):
    # sublane packing granularity in rows for a given native dtype
    # (8 for 4-byte, 16 for 2-byte, 32 for 1-byte types)
    return max(8, 32 // jnp.dtype(dtype).itemsize)


def _balanced_loss_kernel(alpha_ref, x_ref, t_ref, out_ref, *,
                          rows, tile_rows, tiles_per_shard,
                          binary_targets, needs_mask):
    c = pl.program_id(0)   # shard ("core") axis      - parallel
    j = pl.program_id(1)   # row-tile axis per shard  - arbitrary (accumulation)

    @pl.when(j == 0)
    def _():
        out_ref[...] = jnp.zeros_like(out_ref)

    # Cast AFTER the load: HBM traffic stays in the native dtype.
    x = x_ref[...].astype(jnp.float32)
    t = t_ref[...].astype(jnp.float32)

    if binary_targets:
        # Targets guaranteed to be exactly 0/1: one log instead of two.
        p_true = jnp.where(t > 0.5, x, 1.0 - x)
        ce = -jnp.maximum(jnp.log(p_true), jnp.float32(-100.0))
    else:
        # torch.binary_cross_entropy semantics: each log term clamped at -100.
        log_p = jnp.maximum(jnp.log(x), jnp.float32(-100.0))
        log_1mp = jnp.maximum(jnp.log(1.0 - x), jnp.float32(-100.0))
        ce = -(t * log_p + (1.0 - t) * log_1mp)

    a0 = alpha_ref[0]
    a1 = alpha_ref[1]
    weighted = (a0 + (a1 - a0) * t) * ce   # alpha folded: a1*t + a0*(1-t)

    if needs_mask:
        # Mask the tail tile / out-of-range shard tiles (OOB block contents are garbage).
        tile_idx = c * tiles_per_shard + j
        row_start = tile_idx * tile_rows
        local_row = jax.lax.broadcasted_iota(jnp.int32, (tile_rows, LANES), 0)
        weighted = jnp.where(row_start + local_row < rows, weighted, 0.0)

    # Cross-vreg partial reduce on the VPU; the (1, 8, 128) output block stays resident
    # in VMEM across the whole j axis and serves as the accumulator.
    out_ref[...] += weighted.reshape(tile_rows // 8, 8, LANES).sum(axis=0, keepdims=True)


def balanced_loss(inputs, targets, alpha=None, binary_targets=False):
    """Equivalent of BalancedLoss(alpha)(inputs, targets) -> scalar mean loss."""
    assert inputs.shape == targets.shape
    total_n = inputs.size

    # alpha=None -> unit weights (identity), same semantics as the torch branch.
    if alpha is None:
        alpha_arr = jnp.array([1.0, 1.0], dtype=jnp.float32)
    else:
        alpha_arr = jnp.asarray(alpha, dtype=jnp.float32).reshape(2)

    # Flatten in native dtype (no HBM upcast copy).
    flat_x = inputs.reshape(-1)
    flat_t = targets.reshape(-1)

    # Only pad (rarely, and at most one sublane-pack worth of lanes) so the 2-D slab is
    # tileable. Padded elements are (p=0, t=0) -> contribute exactly 0 to the BCE sum.
    pack = max(_row_pack(flat_x.dtype), _row_pack(flat_t.dtype))
    chunk = pack * LANES
    padded_n = ((total_n + chunk - 1) // chunk) * chunk
    pad = padded_n - total_n
    if pad:
        flat_x = jnp.pad(flat_x, (0, pad))
        flat_t = jnp.pad(flat_t, (0, pad))

    rows = padded_n // LANES
    x2d = flat_x.reshape(rows, LANES)
    t2d = flat_t.reshape(rows, LANES)

    tile_rows = rows if rows <= MAX_TILE_ROWS else MAX_TILE_ROWS
    num_tiles = -(-rows // tile_rows)
    tiles_per_shard = -(-num_tiles // NUM_SHARDS)
    grid = (NUM_SHARDS, tiles_per_shard)
    # Mask only when the grid covers more rows than actually exist.
    needs_mask = (NUM_SHARDS * tiles_per_shard * tile_rows) != rows

    def data_map(c, j):
        # Clamp so out-of-range shard tiles DMA a valid (fully masked-out) block.
        return (jnp.minimum(c * tiles_per_shard + j, num_tiles - 1), 0)

    n_log = total_n if binary_targets else 2 * total_n
    cost = pl.CostEstimate(
        flops=8 * total_n,
        transcendentals=n_log,
        bytes_accessed=(x2d.size * jnp.dtype(x2d.dtype).itemsize
                        + t2d.size * jnp.dtype(t2d.dtype).itemsize
                        + NUM_SHARDS * 8 * LANES * 4),
    )

    partials = pl.pallas_call(
        functools.partial(
            _balanced_loss_kernel,
            rows=rows,
            tile_rows=tile_rows,
            tiles_per_shard=tiles_per_shard,
            binary_targets=binary_targets,
            needs_mask=needs_mask,
        ),
        out_shape=jax.ShapeDtypeStruct((NUM_SHARDS, 8, LANES), jnp.float32),
        grid_spec=pltpu.PrefetchScalarGridSpec(
            num_scalar_prefetch=0,
            grid=grid,
            in_specs=[
                pl.BlockSpec(memory_space=pltpu.SMEM),               # alpha (2,)
                pl.BlockSpec((tile_rows, LANES), data_map),           # inputs tile
                pl.BlockSpec((tile_rows, LANES), data_map),           # targets tile
            ],
            out_specs=pl.BlockSpec((1, 8, LANES), lambda c, j: (c, 0, 0)),
        ),
        compiler_params=pltpu.CompilerParams(
            dimension_semantics=("parallel", "arbitrary"),
        ),
        cost_estimate=cost,
    )(alpha_arr, x2d, t2d)

    # Tiny final reduce + mean normalization in the wrapper.
    return partials.sum() / jnp.float32(total_n)


def _reference(inputs, targets, alpha=None):
    p = inputs.astype(jnp.float32)
    t = targets.astype(jnp.float32)
    ce = -(t * jnp.maximum(jnp.log(p), -100.0)
           + (1.0 - t) * jnp.maximum(jnp.log(1.0 - p), -100.0))
    if alpha is not None:
        a = jnp.asarray(alpha, dtype=jnp.float32)
        ce = (a[1] * t + a[0] * (1.0 - t)) * ce
    return jnp.mean(ce)


if __name__ == "__main__":
    key = jax.random.PRNGKey(0)
    k1, k2, k3, k4 = jax.random.split(key, 4)

    B, C, H, W = 2, 4, 16, 16
    # inputs are probabilities (post-sigmoid), targets are binary labels
    inputs = jax.nn.sigmoid(jax.random.normal(k1, (B, C, H, W), dtype=jnp.float32))
    targets = (jax.random.uniform(k2, (B, C, H, W)) > 0.5).astype(jnp.float32)

    alpha = (0.25, 0.75)  # deterministic class-balancing weights

    loss = jax.block_until_ready(balanced_loss(inputs, targets, alpha=alpha))
    ref = _reference(inputs, targets, alpha=alpha)
    assert jnp.allclose(loss, ref, rtol=1e-5, atol=1e-6), (loss, ref)

    # alpha=None branch
    loss_na = jax.block_until_ready(balanced_loss(inputs, targets, alpha=None))
    ref_na = _reference(inputs, targets, alpha=None)
    assert jnp.allclose(loss_na, ref_na, rtol=1e-5, atol=1e-6), (loss_na, ref_na)

    # single-log fast path (valid because targets are exactly 0/1)
    loss_bin = jax.block_until_ready(
        balanced_loss(inputs, targets, alpha=alpha, binary_targets=True))
    assert jnp.allclose(loss_bin, ref, rtol=1e-5, atol=1e-6), (loss_bin, ref)

    # ragged shape: exercises the minimal-pad path and the in-kernel tail mask
    xo = jax.nn.sigmoid(jax.random.normal(k3, (3, 5, 7, 11), dtype=jnp.float32))
    to = (jax.random.uniform(k4, (3, 5, 7, 11)) > 0.5).astype(jnp.float32)
    loss_o = jax.block_until_ready(balanced_loss(xo, to, alpha=alpha))
    ref_o = _reference(xo, to, alpha=alpha)
    assert jnp.allclose(loss_o, ref_o, rtol=1e-5, atol=1e-6), (loss_o, ref_o)

    print("KERNEL_OK")
</pallas_src>

<mosaic_0001>
module attributes {stable_mosaic.version = 11 : i64} {
  func.func @_balanced_loss_kernel(%arg0: i32, %arg1: i32, %arg2: memref<2xf32, #tpu.memory_space<smem>>, %arg3: memref<16x128xf32, #tpu.memory_space<vmem>>, %arg4: memref<16x128xf32, #tpu.memory_space<vmem>>, %arg5: memref<1x8x128xf32, #tpu.memory_space<vmem>>) attributes {dimension_semantics = [#tpu.dimension_semantics<parallel>, #tpu.dimension_semantics<arbitrary>], iteration_bounds = array<i64: 2, 1>, scalar_prefetch = 0 : i64, scratch_operands = 0 : i64, tpu.core_type = #tpu.core_type<tc>, window_params = [{transform_indices = @transform_0, window_bounds = array<i64: 2>}, {transform_indices = @transform_1, window_bounds = array<i64: 16, 128>}, {transform_indices = @transform_2, window_bounds = array<i64: 16, 128>}, {transform_indices = @transform_3, window_bounds = array<i64: 1, 8, 128>}]} {
    %c0_i32 = arith.constant 0 : i32
    %0 = arith.cmpi eq, %arg1, %c0_i32 : i32
    %1 = arith.extui %0 : i1 to i32
    %c0_i32_0 = arith.constant 0 : i32
    %2 = arith.cmpi ne, %1, %c0_i32_0 : i32
    scf.if %2 {
      %cst_18 = arith.constant 0.000000e+00 : f32
      %44 = vector.broadcast %cst_18 : f32 to vector<1x8x128xf32>
      %c0_19 = arith.constant 0 : index
      %c0_20 = arith.constant 0 : index
      %c0_21 = arith.constant 0 : index
      %45 = vector.load %arg5[%c0_19, %c0_20, %c0_21] : memref<1x8x128xf32, #tpu.memory_space<vmem>>, vector<1x8x128xf32>
      tpu.vector_store %arg5[%c0_19, %c0_20, %c0_21], %44 {strides = array<i32>} : memref<1x8x128xf32, #tpu.memory_space<vmem>>, vector<1x8x128xf32>,
    } else {
    }
    %c0 = arith.constant 0 : index
    %c0_1 = arith.constant 0 : index
    %3 = vector.load %arg3[%c0, %c0_1] : memref<16x128xf32, #tpu.memory_space<vmem>>, vector<16x128xf32>
    %c0_2 = arith.constant 0 : index
    %c0_3 = arith.constant 0 : index
    %4 = vector.load %arg4[%c0_2, %c0_3] : memref<16x128xf32, #tpu.memory_space<vmem>>, vector<16x128xf32>
    %5 = math.log %3 : vector<16x128xf32>
    %cst = arith.constant -1.000000e+02 : f32
    %6 = vector.broadcast %cst : f32 to vector<16x128xf32>
    %7 = arith.maximumf %5, %6 : vector<16x128xf32>
    %cst_4 = arith.constant 1.000000e+00 : f32
    %8 = vector.broadcast %cst_4 : f32 to vector<16x128xf32>
    %9 = arith.subf %8, %3 : vector<16x128xf32>
    %10 = math.log %9 : vector<16x128xf32>
    %cst_5 = arith.constant -1.000000e+02 : f32
    %11 = vector.broadcast %cst_5 : f32 to vector<16x128xf32>
    %12 = arith.maximumf %10, %11 : vector<16x128xf32>
    %13 = arith.mulf %4, %7 : vector<16x128xf32>
    %cst_6 = arith.constant 1.000000e+00 : f32
    %14 = vector.broadcast %cst_6 : f32 to vector<16x128xf32>
    %15 = arith.subf %14, %4 : vector<16x128xf32>
    %16 = arith.mulf %15, %12 : vector<16x128xf32>
    %17 = arith.addf %13, %16 : vector<16x128xf32>
    %cst_7 = arith.constant 0.000000e+00 : f32
    %18 = vector.broadcast %cst_7 : f32 to vector<16x128xf32>
    %19 = arith.subf %18, %17 : vector<16x128xf32>
    %c0_8 = arith.constant 0 : index
    %20 = memref.load %arg2[%c0_8] : memref<2xf32, #tpu.memory_space<smem>>
    %c1 = arith.constant 1 : index
    %21 = memref.load %arg2[%c1] : memref<2xf32, #tpu.memory_space<smem>>
    %22 = arith.subf %21, %20 : f32
    %23 = vector.broadcast %22 : f32 to vector<16x128xf32>
    %24 = arith.mulf %23, %4 : vector<16x128xf32>
    %25 = vector.broadcast %20 : f32 to vector<16x128xf32>
    %26 = arith.addf %25, %24 : vector<16x128xf32>
    %27 = arith.mulf %26, %19 : vector<16x128xf32>
    %c1_i32 = arith.constant 1 : i32
    %28 = arith.muli %arg0, %c1_i32 : i32
    %29 = arith.addi %28, %arg1 : i32
    %c16_i32 = arith.constant 16 : i32
    %30 = arith.muli %29, %c16_i32 : i32
    %31 = tpu.iota {dimensions = array<i32: 0>} : vector<16x128xi32>
    %32 = vector.broadcast %30 : i32 to vector<16x128xi32>
    %33 = arith.addi %32, %31 : vector<16x128xi32>
    %c16_i32_9 = arith.constant 16 : i32
    %34 = vector.broadcast %c16_i32_9 : i32 to vector<16x128xi32>
    %35 = arith.cmpi slt, %33, %34 : vector<16x128xi32>
    %cst_10 = arith.constant 0.000000e+00 : f32
    %36 = vector.broadcast %cst_10 : f32 to vector<16x128xf32>
    %37 = arith.select %35, %27, %36 : vector<16x128xi1>, vector<16x128xf32>
    %c0_11 = arith.constant 0 : index
    %c0_12 = arith.constant 0 : index
    %c0_13 = arith.constant 0 : index
    %38 = vector.load %arg5[%c0_11, %c0_12, %c0_13] : memref<1x8x128xf32, #tpu.memory_space<vmem>>, vector<1x8x128xf32>
    %39 = vector.shape_cast %37 : vector<16x128xf32> to vector<2x8x128xf32>
    %cst_14 = arith.constant dense<0.000000e+00> : vector<8x128xf32>
    %40 = vector.multi_reduction <add>, %39, %cst_14 [0] : vector<2x8x128xf32> to vector<8x128xf32>
    %41 = vector.shape_cast %40 : vector<8x128xf32> to vector<1x8x128xf32>
    %42 = arith.addf %38, %41 : vector<1x8x128xf32>
    %c0_15 = arith.constant 0 : index
    %c0_16 = arith.constant 0 : index
    %c0_17 = arith.constant 0 : index
    %43 = vector.load %arg5[%c0_15, %c0_16, %c0_17] : memref<1x8x128xf32, #tpu.memory_space<vmem>>, vector<1x8x128xf32>
    tpu.vector_store %arg5[%c0_15, %c0_16, %c0_17], %42 {strides = array<i32>} : memref<1x8x128xf32, #tpu.memory_space<vmem>>, vector<1x8x128xf32>,
    return
  }
  func.func @transform_0(%arg0: i32, %arg1: i32) -> i32 {
    %c0_i32 = arith.constant 0 : i32
    %c0_i32_0 = arith.constant 0 : i32
    return %c0_i32 : i32
  }
  func.func @transform_1(%arg0: i32, %arg1: i32) -> (i32, i32) {
    %c1_i32 = arith.constant 1 : i32
    %0 = arith.muli %arg0, %c1_i32 : i32
    %1 = arith.addi %0, %arg1 : i32
    %c0_i32 = arith.constant 0 : i32
    %2 = arith.minsi %1, %c0_i32 : i32
    %c0_i32_0 = arith.constant 0 : i32
    %c0_i32_1 = arith.constant 0 : i32
    return %2, %c0_i32_0 : i32, i32
  }
  func.func @transform_2(%arg0: i32, %arg1: i32) -> (i32, i32) {
    %c1_i32 = arith.constant 1 : i32
    %0 = arith.muli %arg0, %c1_i32 : i32
    %1 = arith.addi %0, %arg1 : i32
    %c0_i32 = arith.constant 0 : i32
    %2 = arith.minsi %1, %c0_i32 : i32
    %c0_i32_0 = arith.constant 0 : i32
    %c0_i32_1 = arith.constant 0 : i32
    return %2, %c0_i32_0 : i32, i32
  }
  func.func @transform_3(%arg0: i32, %arg1: i32) -> (i32, i32, i32) {
    %c0_i32 = arith.constant 0 : i32
    %c0_i32_0 = arith.constant 0 : i32
    %c0_i32_1 = arith.constant 0 : i32
    return %arg0, %c0_i32, %c0_i32_0 : i32, i32, i32
  }
}

</mosaic_0001>

<bundles_post_ra>
// kernel: tpu_custom_call.1
= control target key start
LH: loop header
LB: loop body
LE: loop exit
PB: predicated region body
PF: predicated region fallthrough
CT: control target
= control target key end

     0   :  { %s1010_s0 = inlined_call_operand.hbm [shape: f32[2], index: 0, kind: input, shape index: {}]   ;;  %s1011_s1 = inlined_call_operand.hbm [shape: f32[16,128], index: 1, kind: input, shape index: {}]   ;;  %s1012_s2 = inlined_call_operand.hbm [shape: f32[16,128], index: 2, kind: input, shape index: {}]   ;;  %s1013_s3 = inlined_call_operand.hbm [shape: f32[2,8,128], index: 3, kind: output, shape index: {}]  }
   0x1   :  { %1015 = sst [smem:[#allocation15_spill]] %s1010_s0 }
   0x2   :  { %8 = vsyncpa [#allocation5], 0 }
   0x3   :  { %9 = vsyncpa [#allocation3], 0 }
   0x4   :  { %11 = vsyncpa [#allocation3 + $0x1], 0 }
   0x5   :  { %12 = vsyncpa [#allocation8], 0 }
   0x6   :  { %14 = vsyncpa [#allocation8 + $0x1], 0 }
   0x7   :  { %15 = vsyncpa [#allocation4], 0 }
   0x8   :  { %17 = vsyncpa [#allocation4 + $0x1], 0  ;;  %s824_s12 = smov 0   ;;  %s826_s13 = smov 0  }
   0x9   :  { %s828_s14 = smov 0   ;;  %s830_s15 = smov 0  }
   0xa   :  { %s832_s16 = smov 0   ;;  %s834_s17 = smov 0  }
   0xb   :  { %s836_s18 = smov 0   ;;  %s838_s19 = smov 0  }
   0xc LB: > { %s474_s20 = sadd.s32 4294967295, %s797_s19   ;;  %s475_s21 = sadd.s32 4294967294, %s797_s19   ;;  %s797_s19 = sphi %s838_s19, %s23_s19   ;;  %s793_s18 = sphi %s836_s18, %s1031_s18   ;;  %s789_s17 = sphi %s834_s17, %s1030_s17   ;;  %s785_s16 = sphi %s832_s16, %s1000_s16   ;;  %s781_s15 = sphi %s830_s15, %s1029_s15   ;;  %s777_s14 = sphi %s828_s14, %s1028_s14   ;;  %s773_s13 = sphi %s826_s13, %s1027_s13   ;;  %s769_s12 = sphi %s824_s12, %s1026_s12  }
   0xd   : > { %p766_p0 = scmp.ne.s32.totalorder %s785_s16, 0  ;;  %p77_p1 = scmp.eq.s32.totalorder %s797_s19, 0 }
   0xe   : > { %p82_p2 = scmp.ne.s32.totalorder %s785_s16, %s781_s15  ;;  %p867_p3 = scmp.eq.s32.totalorder %s474_s20, 0 }
   0xf   : > { %s127_s23 = sadd.s32 1, %s777_s14  ;;  %p872_p4 = por %p766_p0, %p77_p1 }
  0x10   : > { %p137_p5 = scmp.ne.s32.totalorder %s777_s14, %s773_s13  ;;  %p880_p6 = por %p867_p3, %p82_p2 }
  0x11   : > { %p138_p7 = scmp.eq.s32.totalorder %s474_s20, 1  ;;  %p143_p8 = scmp.ne.s32.totalorder %s773_s13, %s769_s12 }
  0x12   : > { %p144_p9 = scmp.eq.s32.totalorder %s475_s21, 1  ;;  %p476_p11 = scmp.ge.s32.totalorder %s797_s19, 1 }
  0x13   : > { %p886_p10 = por %p138_p7, %p137_p5  ;;  %p151_p13 = scmp.lt.s32.totalorder %s797_s19, 3 }
  0x14   : > { %p891_p12 = por %p144_p9, %p143_p8  ;;  %s1021_s0 = sld [smem:[#allocation15_spill]] }
  0x15   : > { %p899_p0 = pnand %p476_p11, %p151_p13  ;;  %p478_p1 = scmp.ge.s32.totalorder %s797_s19, 2 }
  0x16   : > { %p524_p5 = scmp.lt.s32.totalorder %s797_s19, 2  ;;  %s799_s6 = smov [#allocation2]  }
  0x17   : > { %p508_p2 = pneg %p899_p0  ;;  %s35_s7 = sadd.s32 1, %s793_s18 }
  0x18   : > { %p911_p8 = pnand %p524_p5, %p872_p4  ;;  %p37_p9 = scmp.ge.s32.totalorder %s35_s7, 2 }
  0x19   : > { %p509_p7 = pnand %p508_p2, %p867_p3  ;;  %s187_s15 = sshll.u32 %s1011_s1, 4  ;;  %s188_s15 = int_to_ptr.hbm [resolvable:$true] %s187_s15 }
  0x1a   : > { %s163_s30 = sshll.u32 %s1021_s0, 4  ;;  %s1033_s7 = smov (%p37_p9, %s35_s7), 0  ;;  %s164_s30 = int_to_ptr.hbm [resolvable:$true] %s163_s30 }
  0x1b   : > { %511 = dma.hbm_to_smem (!%p509_p7), %s164_s30, 16, %s799_s6, [#allocation5]  }
  0x1c   : > { %1024 = sst [smem:[#allocation14_spill]] %s1033_s7  ;;  %s124_s8 = ssub.s32 %s793_s18, %s1033_s7 }
  0x1d   : > { %p125_p11 = scmp.eq.s32.totalorder %s124_s8, 0  ;;  %s800_s20 = smov [#allocation6]  }
  0x1e   : > { %s189_s21 = sshll.u32 %s800_s20, 4  ;;  %s626_s24 = sshra.s32 %s188_s15, 4  ;;  %s190_s21 = int_to_ptr.vmem [resolvable:$true] %s189_s21  ;;  %s627_s24 = int_to_ptr.hbm [resolvable:$true] %s626_s24 }
  0x1f   : > { %s921_s9 = scalar_select %p125_p11, %s777_s14, %s127_s23  }
  0x20   : > { %s628_s28 = scalar_lea.hbm %s627_s24, 16  ;;  %p630_p13 = pneg %p911_p8 }
  0x21   : > { %p629_p4 = scmp.ne.s32.totalorder %s627_s24, %s628_s28  ;;  %s633_s30 = scalar_lea.hbm %s1011_s1, 16 }
  0x22   : > { %p635_p7 = scmp.lt.s32.totalorder %s633_s30, %s628_s28 }
  0x23   : > { %p631_p2 = pnand %p630_p13, %p629_p4 }
  0x25   : > { %p632_p5 = pneg %p631_p2 }
  0x27   : > { %p637_p9 = pnand %p635_p7, %p632_p5 }
  0x29   : > { %640 = shalt.err (!%p637_p9)
}
  0x2a   : > { %s801_s6 = smov 128   ;;  %s802_s8 = smov 8  }
  0x2b   : > { %515 = dma.hbm_to_vmem [thread:$0]  (!%p911_p8), %s188_s15, 256, %s190_s21, [#allocation3], %s801_s6, %s801_s6, %s802_s8  }
  0x2c   : > { %s803_s10 = smov [#allocation7]   ;;  %s212_s0 = sshll.u32 %s1012_s2, 4  ;;  %s213_s0 = int_to_ptr.hbm [resolvable:$true] %s212_s0 }
  0x2d   : > { %s214_s11 = sshll.u32 %s803_s10, 4  ;;  %s656_s7 = sshra.s32 %s213_s0, 4  ;;  %s215_s11 = int_to_ptr.vmem [resolvable:$true] %s214_s11  ;;  %s657_s7 = int_to_ptr.hbm [resolvable:$true] %s656_s7 }
  0x2e   : > { %s658_s23 = scalar_lea.hbm %s657_s7, 16  ;;  %s663_s15 = scalar_lea.hbm %s1012_s2, 16 }
  0x2f   : > { %p659_p11 = scmp.ne.s32.totalorder %s657_s7, %s658_s23  ;;  %p665_p5 = scmp.lt.s32.totalorder %s663_s15, %s658_s23 }
  0x31   : > { %p661_p4 = pnand %p659_p11, %p630_p13 }
  0x33   : > { %p662_p2 = pneg %p661_p4 }
  0x35   : > { %p667_p7 = pnand %p665_p5, %p662_p2 }
  0x37   : > { %670 = shalt.err (!%p667_p7)
}
  0x38   : > { %518 = dma.hbm_to_vmem [thread:$0]  (!%p911_p8), %s213_s0, 256, %s215_s11, [#allocation8], %s801_s6, %s801_s6, %s802_s8  }
  0x39   : > { %226 = sbr.rel (%p899_p0) target bundleno = 100 (0x64), region = 32 }
  0x3e   : > { %751 = dma.done.wait (%p867_p3), [#allocation5], 16  }
  0x3f   : > { %753 = vsyncadd (%p867_p3), [#allocation5], 4294967280  ;;  %s233_s7 = sand.u32 1, %s785_s16  }
  0x40   : > { %s487_s21 = sshll.u32 %s233_s7, 4  ;;  %s234_s30 = scalar_lea.sflag [#allocation3], %s233_s7 }
  0x41   : > { %s237_s10 = scalar_lea.vmem [#allocation6], %s487_s21 }
  0x42   : > { %755 = dma.done.wait (%p880_p6), %s234_s30, 256  }
  0x43   : > { %757 = vsyncadd (%p880_p6), %s234_s30, 4294967040  ;;  %s244_s0 = scalar_lea.sflag [#allocation8], %s233_s7  ;;  %s247_s4 = scalar_lea.vmem [#allocation7], %s487_s21 }
  0x44   : > { %759 = dma.done.wait (%p880_p6), %s244_s0, 256  }
  0x45   : > { %761 = vsyncadd (%p880_p6), %s244_s0, 4294967040 }
  0x46   : > { %253 = sfence }
  0x47   : > { %v290_v0 = vld [vmem:[%s237_s10] sm:$0xff]  ;;  %v291_v1 = vld [vmem:[%s237_s10 + $0x8] sm:$0xff]  ;;  %s962_s22 = sld [smem:[#allocation2]]  ;;  %v331_v4 = vlaneseq  ;;  %s491_s25 = sshll.u32 %s789_s17, 4 }
  0x48   : > { %603 = vlog2.f32 %v290_v0  ;;  %v300_v2 = vsub.f32 1.0, %v290_v0  ;;  %v301_v3 = vsub.f32 1.0, %v291_v1  ;;  %s490_s5 = sld [smem:[#allocation2 + $0x1]]  ;;  %v292_v6 = vld [vmem:[%s247_s4] sm:$0xff]  ;;  %v293_v7 = vld [vmem:[%s247_s4 + $0x8] sm:$0xff]  ;;  %v334_v21 = vstv %s491_s25  ;;  %s274_s8 = sand.u32 1, %s773_s13  }
  0x49   : > { %605 = vlog2.f32 %v291_v1  ;;  %v332_v10 = vshrl.u32 %v331_v4, 7  ;;  %v310_v16 = vsub.f32 1.0, %v292_v6  ;;  %v311_v17 = vsub.f32 1.0, %v293_v7  ;;  %s489_s11 = sshll.u32 %s274_s8, 3  ;;  %s493_s20 = sshll.u32 %s789_s17, 3 }
  0x4a   : > { %607 = vlog2.f32 %v300_v2  ;;  %s356_s28 = scalar_lea.hbm %s1013_s3, %s493_s20  ;;  %s276_s29 = scalar_lea.vmem [#allocation9], %s489_s11 }
  0x4b   : > { %609 = vlog2.f32 %v301_v3  ;;  %v333_v25 = vadd.s32 8, %v332_v10  ;;  %v335_v32 = vadd.s32 %v334_v21, %v332_v10  ;;  %s358_s15 = sshll.u32 %s276_s29, 4  ;;  %s360_s7 = sshll.u32 %s356_s28, 4  ;;  %s359_s15 = int_to_ptr.vmem [resolvable:$true] %s358_s15  ;;  %s361_s7 = int_to_ptr.hbm [resolvable:$true] %s360_s7 }
  0x4c   : > { %s346_s17 = scalar_lea.sflag [#allocation4], %s274_s8  ;;  %s700_s21 = sshra.s32 %s361_s7, 4  ;;  %s701_s21 = int_to_ptr.hbm [resolvable:$true] %s700_s21 }
  0x4d   : > { %v324_v29 = vstv %s962_s22  ;;  %v336_v35 = vadd.s32 %v334_v21, %v333_v25  ;;  %vm337_vm0 = vcmp.lt.s32.totalorder %v335_v32, 16  ;;  %s702_s30 = scalar_lea.hbm %s701_s21, 8  ;;  %s706_s4 = scalar_lea.hbm %s1013_s3, 16 }
  0x4e   : > { %v604_v5 = vpop.eup %603  ;;  %s320_s6 = ssub.f32 %s490_s5, %s962_s22  ;;  %p703_p3 = scmp.ne.s32.totalorder %s701_s21, %s702_s30 }
  0x4f   : > { %v606_v8 = vpop.eup %605  ;;  %v295_v9 = vmul.f32 0.6931472, %v604_v5  ;;  %vm338_vm1 = vcmp.lt.s32.totalorder %v336_v35, 16  ;;  %p707_p8 = scmp.lt.s32.totalorder %s701_s21, %s1013_s3  ;;  %p708_p13 = scmp.lt.s32.totalorder %s706_s4, %s702_s30 }
  0x50   : > { %v608_v11 = vpop.eup %607  ;;  %v297_v12 = vmul.f32 0.6931472, %v606_v8  ;;  %v321_v20 = vstv %s320_s6  ;;  %p704_p6 = pnand %p703_p3, %p886_p10 }
  0x51   : > { %v610_v13 = vpop.eup %609  ;;  %v298_v14 = vmax.f32 %v295_v9, -100.0  ;;  %v303_v15 = vmul.f32 0.6931472, %v608_v11  ;;  %v322_v24 = vmul.f32 %v321_v20, %v292_v6  ;;  %v323_v28 = vmul.f32 %v321_v20, %v293_v7  ;;  %p709_p9 = por %p708_p13, %p707_p8 }
  0x52   : > { %v299_v18 = vmax.f32 %v297_v12, -100.0  ;;  %v305_v19 = vmul.f32 0.6931472, %v610_v13  ;;  %p705_p0 = pneg %p704_p6 }
  0x53   : > { %v306_v22 = vmax.f32 %v303_v15, -100.0  ;;  %v308_v23 = vmul.f32 %v298_v14, %v292_v6  ;;  %v325_v34 = vadd.f32 %v324_v29, %v322_v24  ;;  %v326_v37 = vadd.f32 %v324_v29, %v323_v28 }
  0x54   : > { %v307_v26 = vmax.f32 %v305_v19, -100.0  ;;  %v309_v27 = vmul.f32 %v299_v18, %v293_v7  ;;  %p710_p11 = pnand %p709_p9, %p705_p0 }
  0x55   : > { %v312_v30 = vmul.f32 %v310_v16, %v306_v22 }
  0x56   : > { %v313_v31 = vmul.f32 %v311_v17, %v307_v26 }
  0x57   : > { %v314_v33 = vadd.f32 %v312_v30, %v308_v23 }
  0x58   : > { %v315_v36 = vadd.f32 %v313_v31, %v309_v27 }
  0x59   : > { %v316_v38 = vsub.f32 0.0, %v314_v33 }
  0x5a   : > { %v317_v39 = vsub.f32 0.0, %v315_v36 }
  0x5b   : > { %v327_v40 = vmul.f32 %v325_v34, %v316_v38 }
  0x5c   : > { %v328_v41 = vmul.f32 %v326_v37, %v317_v39 }
  0x5d   : > { %v339_v42 = vsel %vm337_vm0, %v327_v40, 0.0 }
  0x5e   : > { %v340_v43 = vsel %vm338_vm1, %v328_v41, 0.0 }
  0x5f   : > { %v342_v44 = vadd.f32 %v340_v43, %v339_v42 }
  0x61   : > { %344 = vst [vmem:[%s276_s29] sm:$0xff] %v342_v44 }
  0x62   : > { %713 = shalt.err (!%p710_p11)
}
  0x63   : > { %506 = dma.vmem_to_hbm [thread:$0]  (%p886_p10), %s359_s15, 128, %s361_s7, %s346_s17  }
  0x64 PF: > { %s372_s25 = sand.u32 1, %s769_s12   ;;  %p520_p4 = pnand %p478_p1, %p891_p12 }
  0x65   : > { %s373_s6 = scalar_lea.sflag [#allocation4], %s372_s25 }
  0x66   : > { %p521_p2 = pneg %p520_p4 }
  0x68   : > { %763 = dma.done.wait (%p521_p2), %s373_s6, 128  }
  0x69   : > { %765 = vsyncadd (%p521_p2), %s373_s6, 4294967168  ;;  %s23_s19 = sadd.s32 1, %s797_s19   ;;  %s1025_s26 = sld [smem:[#allocation14_spill]] }
  0x6a   : > { %p20_p5 = scmp.ge.s32.totalorder %s23_s19, 4   ;;  %s1026_s12 = smov %s773_s13 }
  0x6b   : > { %s1027_s13 = smov %s777_s14  ;;  %s1028_s14 = smov %s921_s9 }
  0x6c   : > { %s1029_s15 = smov %s785_s16  ;;  %s1000_s16 = smov 0  }
  0x6d   : > { %s1030_s17 = smov %s793_s18  ;;  %22 = sbr.rel (!%p20_p5) target bundleno = 12 (0xc), region = 99 }
  0x6f   : > { %s1031_s18 = smov %s1025_s26 }
  0x72   :  { %379 = vsyncpa [#allocation3], 1 }
  0x73   :  { %381 = vsyncpa [#allocation3 + $0x1], 1 }
  0x74   :  { %382 = vsyncpa [#allocation8], 1 }
  0x75   :  { %384 = vsyncpa [#allocation8 + $0x1], 1 }
  0x76   :  { %385 = vsyncpa [#allocation4], 1 }
  0x77   :  { %387 = vsyncpa [#allocation4 + $0x1], 1 }
  0x78   :  { %388 = vsyncpa [#allocation5], 1 }
  0x79   :  { %390 = vsyncpa [#allocation5 + $0x1], 1 }

</bundles_post_ra>
